<compile_context>
chip_gen: v6e
topology: v6e:2x2x1
jax: 0.10.0
libtpu: 0.0.40
codegen_flags: <defaults>
</compile_context>

<pallas_src>
import math

import jax
import jax.numpy as jnp
from jax.experimental import pallas as pl
from jax.experimental.pallas import tpu as pltpu


def _pool_sum_kernel(x_ref, o_ref, acc_ref):
    """Sum x_ref (TB, TS, D) over axis 1 into acc_ref (TB, D); write out at the end."""
    s = pl.program_id(1)

    @pl.when(s == 0)
    def _init():
        acc_ref[...] = jnp.zeros_like(acc_ref)

    acc_ref[...] += jnp.sum(x_ref[...].astype(acc_ref.dtype), axis=1)

    @pl.when(s == pl.num_programs(1) - 1)
    def _finalize():
        o_ref[...] = acc_ref[...].astype(o_ref.dtype)


def _choose_tiles(B, S, D, itemsize):
    """Pick (TB, TS) so one input block stays ~<= 4 MiB (x2 for double-buffering)."""
    budget_elems = max(1, (4 * 1024 * 1024) // itemsize)

    # Batch tile: multiple of 8 -> sublane-dense (TB, D) output stores.
    tb = B if B <= 8 else 8

    # Set-axis tile: whole S if the (tb, S, D) slab fits, else the largest
    # multiple of 8 that does.
    if tb * S * D <= budget_elems:
        ts = S
    else:
        ts = (budget_elems // (tb * D)) // 8 * 8
        ts = int(min(max(ts, 8), S))
    return tb, ts


def pool_sum(x: jax.Array, *, tb: int | None = None, ts: int | None = None) -> jax.Array:
    """Equivalent of Pool()(x) with the default pool_func: x.sum(dim=-2)."""
    assert x.ndim >= 2, "expected at least (S, D)"
    *lead, S, D = x.shape
    B = int(math.prod(lead)) if lead else 1
    x3 = x.reshape(B, S, D)

    acc_dtype = jnp.float32 if jnp.issubdtype(x.dtype, jnp.floating) else jnp.int32

    auto_tb, auto_ts = _choose_tiles(B, S, D, x.dtype.itemsize)
    tb = auto_tb if tb is None else tb
    ts = auto_ts if ts is None else ts

    # Zero-pad B and S up to tile multiples (zeros are neutral for a sum).
    Bp = pl.cdiv(B, tb) * tb
    Sp = pl.cdiv(S, ts) * ts
    if Bp != B or Sp != S:
        x3 = jnp.pad(x3, ((0, Bp - B), (0, Sp - S), (0, 0)))

    nb, ns = Bp // tb, Sp // ts

    out = pl.pallas_call(
        _pool_sum_kernel,
        out_shape=jax.ShapeDtypeStruct((Bp, D), x.dtype),
        grid=(nb, ns),
        in_specs=[pl.BlockSpec((tb, ts, D), lambda b, s: (b, s, 0))],
        out_specs=pl.BlockSpec((tb, D), lambda b, s: (b, 0)),
        scratch_shapes=[pltpu.VMEM((tb, D), acc_dtype)],
        compiler_params=pltpu.CompilerParams(
            dimension_semantics=("parallel", "arbitrary"),
        ),
    )(x3)

    if Bp != B:
        out = out[:B]
    return out.reshape(*lead, D)


if __name__ == "__main__":
    key = jax.random.PRNGKey(0)
    k1, k2 = jax.random.split(key)

    # Small shape consistent with the module: batch=2, set size=8, hidden=32.
    x = jax.random.normal(k1, (2, 8, 32), dtype=jnp.float32)
    out = pool_sum(x)
    jax.block_until_ready(out)
    ref = jnp.sum(x, axis=-2)
    assert out.shape == ref.shape == (2, 32)
    assert jnp.allclose(out, ref, atol=1e-5, rtol=1e-5)

    # Also exercise the batch-tiled + set-tiled accumulator path (with padding).
    x2 = jax.random.normal(k2, (20, 40, 32), dtype=jnp.float32)
    out2 = pool_sum(x2, tb=8, ts=16)   # Bp=24, Sp=48 -> grid (3, 3)
    jax.block_until_ready(out2)
    ref2 = jnp.sum(x2, axis=-2)
    assert out2.shape == ref2.shape == (20, 32)
    assert jnp.allclose(out2, ref2, atol=1e-4, rtol=1e-5)

    print("KERNEL_OK")
</pallas_src>

<mosaic_0001>
module attributes {stable_mosaic.version = 11 : i64} {
  func.func @_pool_sum_kernel(%arg0: i32, %arg1: i32, %arg2: memref<2x8x32xf32, #tpu.memory_space<vmem>>, %arg3: memref<2x32xf32, #tpu.memory_space<vmem>>, %arg4: memref<2x32xf32, #tpu.memory_space<vmem>>) attributes {dimension_semantics = [#tpu.dimension_semantics<parallel>, #tpu.dimension_semantics<arbitrary>], iteration_bounds = array<i64: 1, 1>, scalar_prefetch = 0 : i64, scratch_operands = 1 : i64, tpu.core_type = #tpu.core_type<tc>, window_params = [{transform_indices = @transform_0, window_bounds = array<i64: 2, 8, 32>}, {transform_indices = @transform_1, window_bounds = array<i64: 2, 32>}]} {
    %c0_i32 = arith.constant 0 : i32
    %0 = arith.cmpi eq, %arg1, %c0_i32 : i32
    %1 = arith.extui %0 : i1 to i32
    %c0_i32_0 = arith.constant 0 : i32
    %2 = arith.cmpi ne, %1, %c0_i32_0 : i32
    scf.if %2 {
      %cst_9 = arith.constant 0.000000e+00 : f32
      %11 = vector.broadcast %cst_9 : f32 to vector<2x32xf32>
      %c0_10 = arith.constant 0 : index
      %c0_11 = arith.constant 0 : index
      %12 = vector.load %arg4[%c0_10, %c0_11] : memref<2x32xf32, #tpu.memory_space<vmem>>, vector<2x32xf32>
      tpu.vector_store %arg4[%c0_10, %c0_11], %11 {strides = array<i32>} : memref<2x32xf32, #tpu.memory_space<vmem>>, vector<2x32xf32>,
    } else {
    }
    %c0 = arith.constant 0 : index
    %c0_1 = arith.constant 0 : index
    %3 = vector.load %arg4[%c0, %c0_1] : memref<2x32xf32, #tpu.memory_space<vmem>>, vector<2x32xf32>
    %c0_2 = arith.constant 0 : index
    %c0_3 = arith.constant 0 : index
    %c0_4 = arith.constant 0 : index
    %4 = vector.load %arg2[%c0_2, %c0_3, %c0_4] : memref<2x8x32xf32, #tpu.memory_space<vmem>>, vector<2x8x32xf32>
    %cst = arith.constant dense<0.000000e+00> : vector<2x32xf32>
    %5 = vector.multi_reduction <add>, %4, %cst [1] : vector<2x8x32xf32> to vector<2x32xf32>
    %6 = arith.addf %3, %5 : vector<2x32xf32>
    %c0_5 = arith.constant 0 : index
    %c0_6 = arith.constant 0 : index
    %7 = vector.load %arg4[%c0_5, %c0_6] : memref<2x32xf32, #tpu.memory_space<vmem>>, vector<2x32xf32>
    tpu.vector_store %arg4[%c0_5, %c0_6], %6 {strides = array<i32>} : memref<2x32xf32, #tpu.memory_space<vmem>>, vector<2x32xf32>,
    %c0_i32_7 = arith.constant 0 : i32
    %8 = arith.cmpi eq, %arg1, %c0_i32_7 : i32
    %9 = arith.extui %8 : i1 to i32
    %c0_i32_8 = arith.constant 0 : i32
    %10 = arith.cmpi ne, %9, %c0_i32_8 : i32
    scf.if %10 {
      %c0_9 = arith.constant 0 : index
      %c0_10 = arith.constant 0 : index
      %11 = vector.load %arg4[%c0_9, %c0_10] : memref<2x32xf32, #tpu.memory_space<vmem>>, vector<2x32xf32>
      %c0_11 = arith.constant 0 : index
      %c0_12 = arith.constant 0 : index
      %12 = vector.load %arg3[%c0_11, %c0_12] : memref<2x32xf32, #tpu.memory_space<vmem>>, vector<2x32xf32>
      tpu.vector_store %arg3[%c0_11, %c0_12], %11 {strides = array<i32>} : memref<2x32xf32, #tpu.memory_space<vmem>>, vector<2x32xf32>,
    } else {
    }
    return
  }
  func.func @transform_0(%arg0: i32, %arg1: i32) -> (i32, i32, i32) {
    %c0_i32 = arith.constant 0 : i32
    %c0_i32_0 = arith.constant 0 : i32
    return %arg0, %arg1, %c0_i32 : i32, i32, i32
  }
  func.func @transform_1(%arg0: i32, %arg1: i32) -> (i32, i32) {
    %c0_i32 = arith.constant 0 : i32
    %c0_i32_0 = arith.constant 0 : i32
    return %arg0, %c0_i32 : i32, i32
  }
}

</mosaic_0001>

<bundles_post_ra>
// kernel: tpu_custom_call.1
= control target key start
LH: loop header
LB: loop body
LE: loop exit
PB: predicated region body
PF: predicated region fallthrough
CT: control target
= control target key end

     0   :  { %6 = vsyncpa [#allocation4], 0  ;;  %s148_s0 = inlined_call_operand.hbm [shape: f32[2,8,32], index: 0, kind: input, shape index: {}]   ;;  %s149_s1 = inlined_call_operand.hbm [shape: f32[2,32], index: 1, kind: output, shape index: {}]  }
   0x1   :  { %7 = vsyncpa [#allocation5], 0  ;;  %s124_s6 = smov [#allocation3]  }
   0x2   :  { %s13_s7 = sshll.u32 %s124_s6, 4  ;;  %s14_s7 = int_to_ptr.vmem [resolvable:$true] %s13_s7 }
   0x3   :  { %s88_s8 = scalar_lea.vmem %s14_s7, 256  ;;  %p93_p1 = scmp.lt.s32.totalorder %s14_s7, %s14_s7 }
   0x4   :  { %p89_p0 = scmp.ne.s32.totalorder %s14_s7, %s88_s8  ;;  %p94_p2 = scmp.lt.s32.totalorder %s88_s8, %s88_s8 }
   0x6   :  { %p95_p3 = por %p94_p2, %p93_p1 }
   0x8   :  { %p96_p4 = pnand %p95_p3, %p89_p0 }
   0xa   :  { %99 = shalt.err (!%p96_p4)
}
   0xb   :  { %s125_s9 = smov 128   ;;  %s126_s10 = smov 8  }
   0xc   :  { %19 = dma.hbm_to_vmem [thread:$0]  %s148_s0, 256, %s14_s7, [#allocation4], %s125_s9, %s125_s9, %s126_s10  }
   0xd   :  { %120 = dma.done.wait [#allocation4], 256  }
   0xe   :  { %121 = vsyncadd [#allocation4], 4294967040  ;;  %vm27_vm0 = vcmask 254976   ;;  %v127_v0 = vmov 0.0   ;;  %vm32_vm1 = vcmask 261120   ;;  %v30_v1 = vld [vmem:[#allocation3] sm:$0xff] }
   0xf   :  { %28 = vst.msk [vmem:[#allocation2] sm:$0x3] %vm27_vm0, %v127_v0  ;;  %v31_v2 = vld [vmem:[#allocation3 + $0x8] sm:$0xff]  ;;  %v33_v3 = vsel %vm32_vm1, %v30_v1, 0.0  ;;  %vm49_vm2 = vcmask 1041409   ;;  %s128_s0 = smov [#allocation6]  }
  0x10   :  { %v40_v4 = vsel %vm32_vm1, %v31_v2, 0.0  ;;  %v34_v5 = vrot.slane %v33_v3, 4  ;;  %s66_s13 = sshll.u32 %s128_s0, 4  ;;  %s67_s13 = int_to_ptr.vmem [resolvable:$true] %s66_s13 }
  0x11   :  { %v41_v6 = vrot.slane %v40_v4, 4  ;;  %s100_s14 = scalar_lea.vmem %s67_s13, 32  ;;  %p105_p6 = scmp.lt.s32.totalorder %s67_s13, %s67_s13 }
  0x12   :  { %v35_v7 = vadd.f32 %v34_v5, %v33_v3  ;;  %p101_p5 = scmp.ne.s32.totalorder %s67_s13, %s100_s14  ;;  %p106_p7 = scmp.lt.s32.totalorder %s100_s14, %s100_s14 }
  0x13   :  { %v42_v8 = vadd.f32 %v41_v6, %v40_v4 }
  0x14   :  { %v36_v9 = vrot.slane %v35_v7, 2  ;;  %p107_p8 = por %p106_p7, %p105_p6 }
  0x15   :  { %v43_v10 = vrot.slane %v42_v8, 2 }
  0x16   :  { %v37_v11 = vadd.f32 %v36_v9, %v35_v7  ;;  %v29_v15 = vld [vmem:[#allocation2] sm:$0x3]  ;;  %p108_p9 = pnand %p107_p8, %p101_p5 }
  0x17   :  { %v44_v12 = vadd.f32 %v43_v10, %v42_v8 }
  0x18   :  { %v38_v13 = vrot.slane %v37_v11, 1 }
  0x19   :  { %v45_v14 = vrot.slane %v44_v12, 1 }
  0x1a   :  { %v39_v16 = vadd.f32 %v38_v13, %v37_v11 }
  0x1b   :  { %v46_v17 = vadd.f32 %v45_v14, %v44_v12 }
  0x1d   :  { %v50_v18 = vsel %vm49_vm2, %v46_v17, %v39_v16 }
  0x1e   :  { %v52_v19 = vadd.f32 %v50_v18, %v29_v15 }
  0x20   :  { %54 = vst.msk [vmem:[#allocation2] sm:$0x3] %vm27_vm0, %v52_v19 }
  0x27   :  { %v58_v20 = vld [vmem:[#allocation2] sm:$0x3] }
  0x28   :  { %59 = vst.msk [vmem:[#allocation6] sm:$0x3] %vm27_vm0, %v58_v20 }
  0x29   :  { %111 = shalt.err (!%p108_p9)
}
  0x2a   :  { %69 = dma.vmem_to_hbm [thread:$0]  %s67_s13, 32, %s149_s1, [#allocation5]  }
  0x2b   :  { %122 = dma.done.wait [#allocation5], 32  }
  0x2c   :  { %123 = vsyncadd [#allocation5], 4294967264 }
  0x2d   :  { %73 = vsyncpa [#allocation4], 1 }
  0x2e   :  { %74 = vsyncpa [#allocation5], 1 }

</bundles_post_ra>
